<compile_context>
chip_gen: v6e
topology: v6e:2x2x1
jax: 0.10.0
libtpu: 0.0.40
codegen_flags: <defaults>
</compile_context>

<pallas_src>
import math

import jax
import jax.numpy as jnp
import numpy as np
from jax.experimental import pallas as pl
from jax.experimental.pallas import tpu as pltpu


def _embed_kernel(x3_ref, w_ref, pe_ref, o_ref):
    # x3_ref: (TL, 3C)  three circular conv windows for this (batch, seq tile)
    # w_ref : (3C, Dp)  fused conv taps (VMEM-resident across the whole grid)
    # pe_ref: (TL, Dp)  positional-encoding rows for this seq tile
    # o_ref : (TL, Dp)  lane-dense output tile
    acc = jnp.dot(x3_ref[...], w_ref[...], preferred_element_type=jnp.float32)
    o_ref[...] = (acc + pe_ref[...]).astype(o_ref.dtype)


def _choose_seq_tile(L, max_tile=512):
    """Largest sequence tile <= max_tile that is a multiple of 8 and divides L
    (or the full L if it already fits / nothing divides)."""
    if L <= max_tile:
        return L
    for t in range(max_tile - max_tile % 8, 7, -8):
        if L % t == 0:
            return t
    return L  # fallback: single tile along L


def data_embedding_wo_time(x, conv_weight, pe, *, max_tile=512):
    """x: [B, L, C]; conv_weight: [D, C, 3] (torch Conv1d layout); pe: [L, D].
    Returns [B, L, D] = circular Conv1d(k=3) embedding + positional encoding
    (dropout = eval-mode identity)."""
    B, L, C = x.shape
    D = conv_weight.shape[0]

    # Fused conv taps: rows [k*C:(k+1)*C] of w are conv_weight[:, :, k].T, so
    # out[t] = concat(x[t-1], x[t], x[t+1]) @ w  reproduces the circular conv.
    w = jnp.transpose(conv_weight, (2, 1, 0)).reshape(3 * C, D).astype(jnp.float32)
    pe_p = pe.astype(jnp.float32)

    # Lane-dense output: pad d_model up to a multiple of 128 if needed.
    Dp = ((D + 127) // 128) * 128
    if Dp != D:
        w = jnp.pad(w, ((0, 0), (0, Dp - D)))
        pe_p = jnp.pad(pe_p, ((0, 0), (0, Dp - D)))

    # Gather the three circular windows once (tiny: 3C columns vs D outputs).
    # x3[b, t] = [x[b, (t-1) % L], x[b, t], x[b, (t+1) % L]]
    x3 = jnp.concatenate(
        [jnp.roll(x, 1, axis=1), x, jnp.roll(x, -1, axis=1)], axis=-1)

    TL = _choose_seq_tile(L, max_tile)
    grid = (B, L // TL)

    # Explicit VMEM budget: double-buffered tiles + f32 intermediate, 2x headroom.
    est = 4 * (2 * (TL * 3 * C) + 2 * (3 * C * Dp) + 2 * (TL * Dp)
               + 2 * (TL * Dp) + TL * Dp)
    vmem_bytes = int(min(64 * 1024 * 1024, max(16 * 1024 * 1024, 2 * est)))

    out = pl.pallas_call(
        _embed_kernel,
        out_shape=jax.ShapeDtypeStruct((B, L, Dp), x.dtype),
        grid_spec=pltpu.PrefetchScalarGridSpec(
            num_scalar_prefetch=0,
            grid=grid,
            in_specs=[
                pl.BlockSpec((None, TL, 3 * C), lambda b, l: (b, l, 0)),  # x3 tile
                pl.BlockSpec((3 * C, Dp), lambda b, l: (0, 0)),           # taps (resident)
                pl.BlockSpec((TL, Dp), lambda b, l: (l, 0)),              # pe rows
            ],
            out_specs=pl.BlockSpec((None, TL, Dp), lambda b, l: (b, l, 0)),
        ),
        compiler_params=pltpu.CompilerParams(
            dimension_semantics=("parallel", "parallel"),
            vmem_limit_bytes=vmem_bytes),
    )(x3, w, pe_p)

    return out if Dp == D else out[..., :D]


def make_positional_encoding(max_len, d_model):
    position = np.arange(max_len, dtype=np.float32)[:, None]
    div_term = np.exp(np.arange(0, d_model, 2, dtype=np.float32)
                      * -(math.log(10000.0) / d_model))
    pe = np.zeros((max_len, d_model), dtype=np.float32)
    pe[:, 0::2] = np.sin(position * div_term)
    pe[:, 1::2] = np.cos(position * div_term)
    return jnp.asarray(pe)


def _reference(x, conv_w, pe):
    """Pure-JAX reference: circular-padded conv1d + positional encoding."""
    B, L, C = x.shape
    xp = jnp.pad(x, ((0, 0), (1, 1), (0, 0)), mode="wrap")
    ref = jnp.zeros((B, L, conv_w.shape[0]), jnp.float32)
    for k in range(3):
        ref = ref + jnp.einsum("blc,dc->bld", xp[:, k:k + L, :], conv_w[:, :, k])
    return ref + pe[None, :, :]


if __name__ == "__main__":
    key = jax.random.PRNGKey(0)
    configs = [
        # (B, L, c_in, d_model, max_tile):
        #   first exercises the D-padding path (32 -> 128), single L tile;
        #   second exercises L-tiling (TL=16, grid=(2, 4)) with lane-dense D.
        (2, 16, 4, 32, 512),
        (2, 64, 7, 128, 16),
    ]
    for (B, L, C, D, max_tile) in configs:
        key, kx, kw = jax.random.split(key, 3)
        x = jax.random.normal(kx, (B, L, C), dtype=jnp.float32)

        # Conv1d weight [d_model, c_in, 3], kaiming_normal_(fan_in, leaky_relu) style
        fan_in = C * 3
        std = math.sqrt(2.0 / fan_in)
        conv_w = std * jax.random.normal(kw, (D, C, 3), dtype=jnp.float32)

        pe = make_positional_encoding(L, D)

        out = data_embedding_wo_time(x, conv_w, pe, max_tile=max_tile)
        out = jax.block_until_ready(out)

        ref = _reference(x, conv_w, pe)
        np.testing.assert_allclose(np.asarray(out), np.asarray(ref),
                                   rtol=1e-5, atol=1e-5)

    print("KERNEL_OK")
</pallas_src>

<mosaic_0001>
module attributes {stable_mosaic.version = 11 : i64} {
  func.func @_embed_kernel(%arg0: i32, %arg1: i32, %arg2: memref<1x16x12xf32, #tpu.memory_space<vmem>>, %arg3: memref<12x128xf32, #tpu.memory_space<vmem>>, %arg4: memref<16x128xf32, #tpu.memory_space<vmem>>, %arg5: memref<1x16x128xf32, #tpu.memory_space<vmem>>) attributes {dimension_semantics = [#tpu.dimension_semantics<parallel>, #tpu.dimension_semantics<parallel>], iteration_bounds = array<i64: 2, 1>, scalar_prefetch = 0 : i64, scratch_operands = 0 : i64, tpu.core_type = #tpu.core_type<tc>, window_params = [{transform_indices = @transform_0, window_bounds = array<i64: 1, 16, 12>}, {pipeline_mode = #tpu.pipeline_mode<synchronous>, transform_indices = @transform_1, window_bounds = array<i64: 12, 128>}, {transform_indices = @transform_2, window_bounds = array<i64: 16, 128>}, {transform_indices = @transform_3, window_bounds = array<i64: 1, 16, 128>}]} {
    %c0 = arith.constant 0 : index
    %c0_0 = arith.constant 0 : index
    %c0_1 = arith.constant 0 : index
    %0 = vector.load %arg2[%c0, %c0_0, %c0_1] : memref<1x16x12xf32, #tpu.memory_space<vmem>>, vector<1x16x12xf32>
    %1 = vector.shape_cast %0 : vector<1x16x12xf32> to vector<16x12xf32>
    %c0_2 = arith.constant 0 : index
    %c0_3 = arith.constant 0 : index
    %2 = vector.load %arg3[%c0_2, %c0_3] : memref<12x128xf32, #tpu.memory_space<vmem>>, vector<12x128xf32>
    %cst = arith.constant dense<0.000000e+00> : vector<16x128xf32>
    %3 = tpu.matmul %1, %2, %cst {dimension_numbers = #tpu.dot_dimension_numbers<[1], [0], [0], [1], [0, 0, 1, 1], [], []>} : vector<16x12xf32>, vector<12x128xf32>, vector<16x128xf32> -> vector<16x128xf32>
    %c0_4 = arith.constant 0 : index
    %c0_5 = arith.constant 0 : index
    %4 = vector.load %arg4[%c0_4, %c0_5] : memref<16x128xf32, #tpu.memory_space<vmem>>, vector<16x128xf32>
    %5 = arith.addf %3, %4 : vector<16x128xf32>
    %c0_6 = arith.constant 0 : index
    %c0_7 = arith.constant 0 : index
    %c0_8 = arith.constant 0 : index
    %6 = vector.load %arg5[%c0_6, %c0_7, %c0_8] : memref<1x16x128xf32, #tpu.memory_space<vmem>>, vector<1x16x128xf32>
    %7 = vector.shape_cast %6 : vector<1x16x128xf32> to vector<16x128xf32>
    %8 = vector.shape_cast %5 : vector<16x128xf32> to vector<1x16x128xf32>
    tpu.vector_store %arg5[%c0_6, %c0_7, %c0_8], %8 {strides = array<i32>} : memref<1x16x128xf32, #tpu.memory_space<vmem>>, vector<1x16x128xf32>,
    return
  }
  func.func @transform_0(%arg0: i32, %arg1: i32) -> (i32, i32, i32) {
    %c0_i32 = arith.constant 0 : i32
    %c0_i32_0 = arith.constant 0 : i32
    return %arg0, %arg1, %c0_i32 : i32, i32, i32
  }
  func.func @transform_1(%arg0: i32, %arg1: i32) -> (i32, i32) {
    %c0_i32 = arith.constant 0 : i32
    %c0_i32_0 = arith.constant 0 : i32
    %c0_i32_1 = arith.constant 0 : i32
    return %c0_i32, %c0_i32_0 : i32, i32
  }
  func.func @transform_2(%arg0: i32, %arg1: i32) -> (i32, i32) {
    %c0_i32 = arith.constant 0 : i32
    %c0_i32_0 = arith.constant 0 : i32
    return %arg1, %c0_i32 : i32, i32
  }
  func.func @transform_3(%arg0: i32, %arg1: i32) -> (i32, i32, i32) {
    %c0_i32 = arith.constant 0 : i32
    %c0_i32_0 = arith.constant 0 : i32
    return %arg0, %arg1, %c0_i32 : i32, i32, i32
  }
}

</mosaic_0001>

<bundles_post_ra>
// kernel: tpu_custom_call.1
= control target key start
LH: loop header
LB: loop body
LE: loop exit
PB: predicated region body
PF: predicated region fallthrough
CT: control target
= control target key end

     0   :  { %8 = vsyncpa [#allocation3], 0  ;;  %s740_s0 = inlined_call_operand.vmem [shape: f32[2,16,12], index: 0, kind: input, shape index: {}]   ;;  %s741_s1 = inlined_call_operand.vmem [shape: f32[12,128], index: 1, kind: input, shape index: {}]   ;;  %s742_s2 = inlined_call_operand.vmem [shape: f32[16,128], index: 2, kind: input, shape index: {}]   ;;  %s743_s3 = inlined_call_operand.hbm [shape: f32[2,16,128], index: 3, kind: output, shape index: {}]  }
   0x1   :  { %10 = vsyncpa [#allocation3 + $0x1], 0  ;;  %s614_s12 = smov 0   ;;  %s616_s13 = smov 0  }
   0x2   :  { %s618_s14 = smov 0   ;;  %s620_s15 = smov 0  }
   0x3   :  { %s622_s16 = smov 0   ;;  %s624_s17 = smov 0  }
   0x4 LB: > { %s426_s18 = sadd.s32 4294967295, %s589_s17   ;;  %s427_s19 = sadd.s32 4294967294, %s589_s17   ;;  %s589_s17 = sphi %s624_s17, %s16_s17   ;;  %s585_s16 = sphi %s622_s16, %s750_s16   ;;  %s581_s15 = sphi %s620_s15, %s749_s15   ;;  %s577_s14 = sphi %s618_s14, %s748_s14   ;;  %s573_s13 = sphi %s616_s13, %s747_s13   ;;  %s569_s12 = sphi %s614_s12, %s746_s12  }
   0x5   : > { %s28_s20 = sadd.s32 1, %s585_s16  ;;  %s112_s21 = sadd.s32 1, %s577_s14 }
   0x6   : > { %p30_p0 = scmp.ge.s32.totalorder %s28_s20, 2  ;;  %p122_p1 = scmp.ne.s32.totalorder %s577_s14, %s573_s13 }
   0x7   : > { %p123_p2 = scmp.eq.s32.totalorder %s426_s18, 1  ;;  %p128_p3 = scmp.ne.s32.totalorder %s573_s13, %s569_s12 }
   0x8   : > { %s752_s20 = smov (%p30_p0, %s28_s20), 0  ;;  %p129_p5 = scmp.eq.s32.totalorder %s427_s19, 1 }
   0x9   : > { %p654_p4 = por %p123_p2, %p122_p1  ;;  %s107_s23 = ssub.s32 %s585_s16, %s752_s20 }
   0xa   : > { %p431_p6 = scmp.ge.s32.totalorder %s589_s17, 1  ;;  %p110_p7 = scmp.eq.s32.totalorder %s107_s23, 0 }
   0xb   : > { %p661_p8 = por %p129_p5, %p128_p3  ;;  %p172_p9 = scmp.lt.s32.totalorder %s589_s17, 3 }
   0xc   : > { %s667_s25 = scalar_select %p110_p7, %s577_s14, %s112_s21  }
   0xd   : > { %p173_p10 = pnand %p431_p6, %p172_p9 }
   0xe   : > { %p206_p11 = scmp.lt.s32.totalorder (!%p173_p10), %s581_s15, 1  ;;  %s202_s8 = sand.u32 (!%p173_p10), 1, %s573_s13  }
   0xf   : > { %176 = sbr.rel (%p173_p10) target bundleno = 237 (0xed), region = 32  ;;  %s432_s9 = sshll.u32 (!%p173_p10), %s202_s8, 4 }
  0x10   : > { %s204_s18 = scalar_lea.vmem (!%p173_p10), [#allocation2], %s432_s9  ;;  %s444_s21 = sshll.u32 (!%p173_p10), %s581_s15, 8 }
  0x11   : > { %s332_s19 = sshll.u32 (!%p173_p10), %s204_s18, 4  ;;  %s693_s29 = scalar_lea.hbm (!%p173_p10), %s743_s3, %s444_s21  ;;  %s688_s19 = int_to_ptr.vmem [resolvable:$true] %s332_s19 }
  0x14   : > { %v225_v0 = vld [vmem:[%s741_s1 + $0x8] sm:$0xf]  ;;  %vm235_vm0 = vcmask 1043456   ;;  %v224_v1 = vld [vmem:[%s741_s1] sm:$0xff]  ;;  %s207_s30 = scalar_select %p206_p11, %s581_s15, 1  ;;  %vm228_vm1 = vcmask 97280  }
  0x15   : > { %449 = vmatprep.subr.msk.mxu0 %vm235_vm0, %v225_v0  ;;  %v227_v4 = vld [vmem:[%s742_s2 + $0x8] sm:$0xff]  ;;  %v226_v6 = vld [vmem:[%s742_s2] sm:$0xff]  ;;  %s695_s15 = scalar_lea.sflag [#allocation3], %s202_s8 }
  0x16   : > { %450 = vmatpush3.msk.msra.mxu0 %vm235_vm0, %v225_v0  ;;  %s443_s4 = sshll.u32 %s207_s30, 4  ;;  %s513_s30 = scalar_lea.vmem %s688_s19, 256 }
  0x17   : > { %451 = vmatprep.subr.mxu0 %v224_v1  ;;  %s213_s7 = scalar_lea.vmem %s740_s0, %s443_s4  ;;  %p514_p12 = scmp.ne.s32.totalorder %s688_s19, %s513_s30 }
  0x18   : > { %452 = vmatpush3.msra.mxu0 %v224_v1  ;;  %v222_v2 = vld [vmem:[%s213_s7] sm:$0xff]  ;;  %v223_v3 = vld [vmem:[%s213_s7 + $0x8] sm:$0xff]  ;;  %s591_s4 = smov [#allocation2]  }
  0x19   : > { %453 = vmatprep.mubr.msk.f32.mxu0 %vm228_vm1, %v222_v2  ;;  %p515_p13 = pnand %p514_p12, %p654_p4  ;;  %s517_s5 = sshll.u32 %s591_s4, 4  ;;  %s518_s5 = int_to_ptr.vmem [resolvable:$false] %s517_s5 }
  0x1a   : > { %454 = vmatmul.mubr.msk.f32.vlgmr.msra.gmra.mxu0 %vm228_vm1, %v223_v3  ;;  %s519_s6 = scalar_lea.vmem %s518_s5, 512  ;;  %p520_p1 = scmp.lt.s32.totalorder %s688_s19, %s518_s5 }
  0x1b   : > { %p516_p0 = pneg %p515_p13  ;;  %p521_p2 = scmp.lt.s32.totalorder %s519_s6, %s513_s30 }
  0x1d   : > { %p522_p3 = por %p521_p2, %p520_p1 }
  0x1f   : > { %p523_p5 = pnand %p522_p3, %p516_p0 }
  0xda   : > { %v455_v5 = vpop.f32.mrf.mxu0 }
  0xdb   : > { %v311_v7 = vadd.f32 %v455_v5, %v227_v4 }
  0xdc   : > { %v305_v8 = vpop.f32.mrf.mxu0 }
  0xdd   : > { %315 = vst [vmem:[%s204_s18 + $0x8] sm:$0xff] %v311_v7  ;;  %v306_v9 = vadd.f32 %v305_v8, %v226_v6 }
  0xdf   : > { %314 = vst [vmem:[%s204_s18] sm:$0xff] %v306_v9 }
  0xe0   : > { %526 = shalt.err (!%p523_p5)
}
  0xe1   : > { %s527_s7 = scalar_lea.hbm %s693_s29, 256  ;;  %s531_s10 = scalar_lea.hbm %s743_s3, 512 }
  0xe2   : > { %p528_p6 = scmp.ne.s32.totalorder %s693_s29, %s527_s7  ;;  %p532_p10 = scmp.lt.s32.totalorder %s693_s29, %s743_s3 }
  0xe3   : > { %p533_p11 = scmp.lt.s32.totalorder %s531_s10, %s527_s7 }
  0xe4   : > { %p529_p7 = pnand %p528_p6, %p654_p4 }
  0xe5   : > { %p534_p12 = por %p533_p11, %p532_p10 }
  0xe6   : > { %p530_p9 = pneg %p529_p7 }
  0xe8   : > { %p535_p13 = pnand %p534_p12, %p530_p9 }
  0xea   : > { %538 = shalt.err (!%p535_p13)
}
  0xeb   : > { %s592_s21 = smov 128   ;;  %s593_s23 = smov 8  }
  0xec   : > { %456 = dma.vmem_to_hbm [thread:$0]  (%p654_p4), %s688_s19, 256, %s693_s29, %s695_s15, %s592_s21, %s592_s21, %s593_s23  }
  0xed PF: > { %p462_p0 = scmp.ge.s32.totalorder %s589_s17, 2  ;;  %s347_s26 = sand.u32 1, %s569_s12  }
  0xee   : > { %s348_s27 = scalar_lea.sflag [#allocation3], %s347_s26 }
  0xef   : > { %p459_p1 = pnand %p462_p0, %p661_p8 }
  0xf1   : > { %p460_p2 = pneg %p459_p1 }
  0xf3   : > { %564 = dma.done.wait (%p460_p2), %s348_s27, 256  }
  0xf4   : > { %566 = vsyncadd (%p460_p2), %s348_s27, 4294967040  ;;  %s16_s17 = sadd.s32 1, %s589_s17   ;;  %s746_s12 = smov %s573_s13 }
  0xf5   : > { %p13_p3 = scmp.ge.s32.totalorder %s16_s17, 4   ;;  %s747_s13 = smov %s577_s14 }
  0xf6   : > { %s748_s14 = smov %s667_s25  ;;  %s749_s15 = smov %s585_s16 }
  0xf7   : > { %s750_s16 = smov %s752_s20  ;;  %15 = sbr.rel (!%p13_p3) target bundleno = 4 (0x4), region = 70 }
  0xfc   :  { %353 = vsyncpa [#allocation3], 1 }
  0xfd   :  { %355 = vsyncpa [#allocation3 + $0x1], 1 }

</bundles_post_ra>
